<compile_context>
chip_gen: v5e
topology: v5e:2x2
jax: 0.10.0
libtpu: 0.0.40
codegen_flags: <defaults>
</compile_context>

<pallas_src>
import jax
import jax.numpy as jnp
import numpy as np
from jax.experimental import pallas as pl
from jax.experimental.pallas import tpu as pltpu


# -----------------------------------------------------------------------------
# Pallas kernel: 2-layer masked (packed-sequence-equivalent) LSTM recurrence,
# wavefront-staggered, fused with the u_fc1 / u_fc2 heads.
# -----------------------------------------------------------------------------
def _lstm_u_kernel(maxlen_ref, seqs_ref, len_ref, feats_ref,
                   wih0_ref, b0_ref, w01_ref, b1_ref,
                   wfc1h_ref, wfc1f_ref, bfc1_ref, wfc2_ref, bfc2_ref,
                   embs_ref, logits_ref,
                   xw0_scr):
    B = feats_ref.shape[0]
    H = w01_ref.shape[0] // 2
    cdt = w01_ref.dtype                       # bf16 (or f32) MXU operand dtype

    lens = len_ref[...]                       # (B, 1) int32
    max_len = maxlen_ref[0]                   # scalar int32 in SMEM
    w01 = w01_ref[...]                        # (2H, 8H) fused [[Whh0, Wih1],[0, Whh1]]
    b1b = jnp.broadcast_to(b1_ref[...], (B, 4 * H))   # hoisted broadcast

    # Hoisted layer-0 input projection (+ fused b_ih0+b_hh0) for ALL timesteps:
    # one (T*B, D) x (D, 4H) matmul, f32 result kept in VMEM scratch.
    xw0_scr[...] = (jnp.dot(seqs_ref[...], wih0_ref[...],
                            preferred_element_type=jnp.float32) + b0_ref[...])

    def cell(gates, c_prev):
        # Fused gate layout [i | f | o | g]: sigmoid over 3H lanes, tanh over H.
        sig = jax.nn.sigmoid(gates[:, :3 * H])
        g = jnp.tanh(gates[:, 3 * H:])
        i = sig[:, 0 * H:1 * H]
        f = sig[:, 1 * H:2 * H]
        o = sig[:, 2 * H:3 * H]
        c_new = f * c_prev + i * g
        h_new = o * jnp.tanh(c_new)
        return h_new, c_new

    zeros = jnp.zeros((B, H), jnp.float32)

    # Wavefront: iteration t runs layer-0 for step t and layer-1 for step t-1, so
    # the two gate matmuls fuse into a single MXU push per step on the carried
    # (vreg-resident) state [h0_{t-1} | h1_{t-2}].
    def body(t, carry):
        h0, c0, h1, c1 = carry
        lhs = jnp.concatenate([h0, h1], axis=-1).astype(cdt)          # (B, 2H)
        g = jnp.dot(lhs, w01, preferred_element_type=jnp.float32)     # (B, 8H)

        # ---- layer 0, timestep t (input projection pre-computed) -----------
        row = pl.multiple_of(t * B, B)
        g0 = g[:, :4 * H] + xw0_scr[pl.ds(row, B), :]
        h0n, c0n = cell(g0, c0)
        m0 = t < lens                                                  # (B, 1)
        h0 = jnp.where(m0, h0n, h0)
        c0 = jnp.where(m0, c0n, c0)

        # ---- layer 1, timestep t-1 ------------------------------------------
        g1 = g[:, 4 * H:] + b1b
        h1n, c1n = cell(g1, c1)
        tm1 = t - 1
        m1 = (tm1 >= jnp.zeros_like(lens)) & (tm1 < lens)              # (B, 1)
        h1 = jnp.where(m1, h1n, h1)
        c1 = jnp.where(m1, c1n, c1)
        return h0, c0, h1, c1

    h0, c0, h1, c1 = jax.lax.fori_loop(
        0, max_len, body, (zeros, zeros, zeros, zeros))

    # Drain: layer-1 for the final timestep (max_len - 1); only sequences whose
    # length equals max_len still need this update (others froze inside the loop).
    lhs = jnp.concatenate([h0, h1], axis=-1).astype(cdt)
    g1 = jnp.dot(lhs, w01[:, 4 * H:], preferred_element_type=jnp.float32) + b1b
    h1n, _ = cell(g1, c1)
    h_last = jnp.where((max_len - 1) < lens, h1n, h1)   # == ht[-1] of the LSTM

    # Head: embs = u_fc1(cat(h_last, feats)); logits = u_fc2(embs).
    # The non-128-aligned lane concat is replaced by a split matmul.
    embs = (jnp.dot(h_last.astype(cdt), wfc1h_ref[...],
                    preferred_element_type=jnp.float32)
            + jnp.dot(feats_ref[...].astype(cdt), wfc1f_ref[...],
                      preferred_element_type=jnp.float32)
            + bfc1_ref[...])
    logits = (jnp.dot(embs.astype(cdt), wfc2_ref[...],
                      preferred_element_type=jnp.float32)
              + bfc2_ref[...])
    embs_ref[...] = embs
    logits_ref[...] = logits


@jax.jit
def bipartite_u_forward(seqs, lengths, feats, kparams):
    """select='u' branch of BipartiteAltBatcher.forward (h0=None, feats given)."""
    T, B, D = seqs.shape
    H = kparams["w01"].shape[0] // 2
    E = kparams["wfc1h"].shape[1]
    cdt = kparams["w01"].dtype

    # Layout assumptions the kernel relies on for full efficiency.
    assert B % 8 == 0, "batch must be sublane-aligned (B % 8 == 0)"
    assert (4 * H) % 128 == 0, "gate tile must be lane-dense (4*hidden % 128 == 0)"

    seqs2d = seqs.reshape(T * B, D).astype(cdt)       # time-major rows: [t*B + b]
    lengths2d = lengths.astype(jnp.int32).reshape(B, 1)
    max_len = jnp.max(lengths).astype(jnp.int32).reshape(1)

    vmem = pl.BlockSpec(memory_space=pltpu.MemorySpace.VMEM)
    smem = pl.BlockSpec(memory_space=pltpu.MemorySpace.SMEM)

    embs, logits = pl.pallas_call(
        _lstm_u_kernel,
        out_shape=(jax.ShapeDtypeStruct((B, E), jnp.float32),
                   jax.ShapeDtypeStruct((B, 2), jnp.float32)),
        in_specs=[smem] + [vmem] * 12,
        out_specs=(vmem, vmem),
        scratch_shapes=[pltpu.VMEM((T * B, 4 * H), jnp.float32)],  # hoisted x@W_ih0+b0
    )(max_len, seqs2d, lengths2d, feats,
      kparams["wih0"], kparams["b0"], kparams["w01"], kparams["b1"],
      kparams["wfc1h"], kparams["wfc1f"], kparams["bfc1"],
      kparams["wfc2"], kparams["bfc2"])
    return embs, logits


# -----------------------------------------------------------------------------
# Parameter construction: raw PyTorch-layout weights (gate order i,f,g,o), then a
# packer that builds the fused / reordered / bf16 kernel layout.
# -----------------------------------------------------------------------------
def make_torch_params(key, feat_dim, emb_dim, hidden_dim, u_feat_dim):
    D = feat_dim + emb_dim
    H = hidden_dim
    E = emb_dim
    k = 1.0 / np.sqrt(H)
    keys = jax.random.split(key, 12)
    u = lambda kk, shape, s: jax.random.uniform(kk, shape, jnp.float32, -s, s)
    p = dict(
        wih0=u(keys[0], (4 * H, D), k), whh0=u(keys[1], (4 * H, H), k),
        bih0=u(keys[2], (4 * H,), k), bhh0=u(keys[3], (4 * H,), k),
        wih1=u(keys[4], (4 * H, H), k), whh1=u(keys[5], (4 * H, H), k),
        bih1=u(keys[6], (4 * H,), k), bhh1=u(keys[7], (4 * H,), k),
    )
    k1 = 1.0 / np.sqrt(H + u_feat_dim)
    p["wfc1"] = u(keys[8], (E, H + u_feat_dim), k1)   # Linear(H+F, E)
    p["bfc1"] = u(keys[9], (E,), k1)
    k2 = 1.0 / np.sqrt(E)
    p["wfc2"] = u(keys[10], (2, E), k2)               # Linear(E, 2)
    p["bfc2"] = u(keys[11], (2,), k2)
    return p


def _ifog(w):
    """PyTorch LSTM gate rows (i, f, g, o) -> kernel layout (i, f, o, g)."""
    H = w.shape[0] // 4
    return jnp.concatenate([w[:2 * H], w[3 * H:], w[2 * H:3 * H]], axis=0)


def pack_params(p, compute_dtype=jnp.bfloat16):
    H = p["whh0"].shape[1]
    wih0 = _ifog(p["wih0"]).T.astype(compute_dtype)            # (D, 4H)
    b0 = _ifog(p["bih0"] + p["bhh0"]).reshape(1, -1)           # (1, 4H) f32
    whh0 = _ifog(p["whh0"]).T                                  # (H, 4H)
    wih1 = _ifog(p["wih1"]).T                                  # (H, 4H)
    whh1 = _ifog(p["whh1"]).T                                  # (H, 4H)
    # Fused wavefront weight: [h0 | h1] @ [[Whh0, Wih1], [0, Whh1]] -> (B, 8H)
    top = jnp.concatenate([whh0, wih1], axis=1)                # (H, 8H)
    bot = jnp.concatenate([jnp.zeros_like(whh1), whh1], axis=1)
    w01 = jnp.concatenate([top, bot], axis=0).astype(compute_dtype)   # (2H, 8H)
    b1 = _ifog(p["bih1"] + p["bhh1"]).reshape(1, -1)           # (1, 4H) f32
    wfc1_t = p["wfc1"].T.astype(compute_dtype)                 # (H + F, E)
    return dict(
        wih0=wih0,
        b0=b0.astype(jnp.float32),
        w01=w01,
        b1=b1.astype(jnp.float32),
        wfc1h=wfc1_t[:H],                                      # (H, E) hidden part
        wfc1f=wfc1_t[H:],                                      # (F, E) feats part
        bfc1=p["bfc1"].reshape(1, -1).astype(jnp.float32),
        wfc2=p["wfc2"].T.astype(compute_dtype),                # (E, 2)
        bfc2=p["bfc2"].reshape(1, -1).astype(jnp.float32),
    )


# -----------------------------------------------------------------------------
# Pure-JAX reference: naive un-fused 2-layer masked LSTM with PyTorch gate order.
# Matmul operands are cast to the same compute dtype as the kernel so the check is
# independent of the TPU's default f32-matmul precision (operands pinned to bf16,
# f32 accumulation on both sides).
# -----------------------------------------------------------------------------
def ref_forward(seqs, lengths, feats, p, compute_dtype=jnp.bfloat16):
    T, B, _ = seqs.shape
    H = p["whh0"].shape[1]

    def dot(a, b):
        return jnp.dot(a.astype(compute_dtype), b.astype(compute_dtype),
                       preferred_element_type=jnp.float32)

    def cell(x, h, c, wih, whh, bih, bhh):
        g = dot(x, wih.T) + dot(h, whh.T) + bih + bhh
        i = jax.nn.sigmoid(g[:, 0 * H:1 * H])
        f = jax.nn.sigmoid(g[:, 1 * H:2 * H])
        gg = jnp.tanh(g[:, 2 * H:3 * H])
        o = jax.nn.sigmoid(g[:, 3 * H:4 * H])
        c_new = f * c + i * gg
        return o * jnp.tanh(c_new), c_new

    h0 = c0 = h1 = c1 = jnp.zeros((B, H), jnp.float32)
    lens = lengths.astype(jnp.int32).reshape(B, 1)
    for t in range(T):
        m = t < lens
        hn0, cn0 = cell(seqs[t], h0, c0, p["wih0"], p["whh0"], p["bih0"], p["bhh0"])
        h0 = jnp.where(m, hn0, h0)
        c0 = jnp.where(m, cn0, c0)
        hn1, cn1 = cell(h0, h1, c1, p["wih1"], p["whh1"], p["bih1"], p["bhh1"])
        h1 = jnp.where(m, hn1, h1)
        c1 = jnp.where(m, cn1, c1)
    h_cat = jnp.concatenate([h1, feats], axis=-1)
    embs = dot(h_cat, p["wfc1"].T) + p["bfc1"]
    logits = dot(embs, p["wfc2"].T) + p["bfc2"]
    return embs, logits


if __name__ == "__main__":
    # Module hyper-parameters (small, consistent with the forward pass).
    feat_dim, emb_dim, hidden_dim, n_layers, u_feat_dim = 8, 8, 32, 2, 4
    T, B = 8, 8
    D = feat_dim + emb_dim

    key = jax.random.PRNGKey(0)
    k_seq, k_feat, k_len, k_par = jax.random.split(key, 4)

    seqs = jax.random.normal(k_seq, (T, B, D), jnp.float32)      # time-major
    feats = jax.random.normal(k_feat, (B, u_feat_dim), jnp.float32)
    lengths = jax.random.randint(k_len, (B,), 2, T + 1, jnp.int32)

    raw = make_torch_params(k_par, feat_dim, emb_dim, hidden_dim, u_feat_dim)
    kparams = pack_params(raw, compute_dtype=jnp.bfloat16)

    embs, logits = bipartite_u_forward(seqs, lengths, feats, kparams)
    jax.block_until_ready((embs, logits))

    # Tolerance: operands are deliberately bf16 (MXU-native rate) on BOTH sides, so
    # kernel-vs-reference differences are bounded by f32 summation-order deltas plus
    # occasional 1-ulp bf16 re-rounding of the recurrent state (~1e-3 worst case over
    # T=8 steps).  5e-3 is 2x tighter than before and still catches any gate-reorder
    # / bias-fusion / masking bug (those produce O(0.1) errors).
    embs_ref, logits_ref = ref_forward(seqs, lengths, feats, raw, jnp.bfloat16)
    np.testing.assert_allclose(np.asarray(embs), np.asarray(embs_ref),
                               rtol=5e-3, atol=5e-3)
    np.testing.assert_allclose(np.asarray(logits), np.asarray(logits_ref),
                               rtol=5e-3, atol=5e-3)

    print("KERNEL_OK")
</pallas_src>

<mosaic_0001>
module attributes {stable_mosaic.version = 11 : i64} {
  func.func @_lstm_u_kernel(%arg0: memref<1xi32, #tpu.memory_space<smem>>, %arg1: memref<64x16xbf16, #tpu.memory_space<vmem>>, %arg2: memref<8x1xi32, #tpu.memory_space<vmem>>, %arg3: memref<8x4xf32, #tpu.memory_space<vmem>>, %arg4: memref<16x128xbf16, #tpu.memory_space<vmem>>, %arg5: memref<1x128xf32, #tpu.memory_space<vmem>>, %arg6: memref<64x256xbf16, #tpu.memory_space<vmem>>, %arg7: memref<1x128xf32, #tpu.memory_space<vmem>>, %arg8: memref<32x8xbf16, #tpu.memory_space<vmem>>, %arg9: memref<4x8xbf16, #tpu.memory_space<vmem>>, %arg10: memref<1x8xf32, #tpu.memory_space<vmem>>, %arg11: memref<8x2xbf16, #tpu.memory_space<vmem>>, %arg12: memref<1x2xf32, #tpu.memory_space<vmem>>, %arg13: memref<8x8xf32, #tpu.memory_space<vmem>>, %arg14: memref<8x2xf32, #tpu.memory_space<vmem>>, %arg15: memref<64x128xf32, #tpu.memory_space<vmem>>) attributes {dimension_semantics = [], scalar_prefetch = 0 : i64, scratch_operands = 1 : i64, tpu.core_type = #tpu.core_type<tc>} {
    %c0 = arith.constant 0 : index
    %c0_0 = arith.constant 0 : index
    %0 = vector.load %arg2[%c0, %c0_0] : memref<8x1xi32, #tpu.memory_space<vmem>>, vector<8x1xi32>
    %c0_1 = arith.constant 0 : index
    %1 = memref.load %arg0[%c0_1] : memref<1xi32, #tpu.memory_space<smem>>
    %c0_2 = arith.constant 0 : index
    %c0_3 = arith.constant 0 : index
    %2 = vector.load %arg6[%c0_2, %c0_3] : memref<64x256xbf16, #tpu.memory_space<vmem>>, vector<64x256xbf16>
    %c0_4 = arith.constant 0 : index
    %c0_5 = arith.constant 0 : index
    %3 = vector.load %arg7[%c0_4, %c0_5] : memref<1x128xf32, #tpu.memory_space<vmem>>, vector<1x128xf32>
    %4 = vector.shape_cast %3 : vector<1x128xf32> to vector<1x128xf32>
    %5 = vector.broadcast %4 : vector<1x128xf32> to vector<8x128xf32>
    %c0_6 = arith.constant 0 : index
    %c0_7 = arith.constant 0 : index
    %6 = vector.load %arg1[%c0_6, %c0_7] : memref<64x16xbf16, #tpu.memory_space<vmem>>, vector<64x16xbf16>
    %c0_8 = arith.constant 0 : index
    %c0_9 = arith.constant 0 : index
    %7 = vector.load %arg4[%c0_8, %c0_9] : memref<16x128xbf16, #tpu.memory_space<vmem>>, vector<16x128xbf16>
    %cst = arith.constant dense<0.000000e+00> : vector<64x128xf32>
    %8 = tpu.matmul %6, %7, %cst {dimension_numbers = #tpu.dot_dimension_numbers<[1], [0], [0], [1], [0, 0, 1, 1], [], []>} : vector<64x16xbf16>, vector<16x128xbf16>, vector<64x128xf32> -> vector<64x128xf32>
    %c0_10 = arith.constant 0 : index
    %c0_11 = arith.constant 0 : index
    %9 = vector.load %arg5[%c0_10, %c0_11] : memref<1x128xf32, #tpu.memory_space<vmem>>, vector<1x128xf32>
    %10 = vector.broadcast %9 : vector<1x128xf32> to vector<64x128xf32>
    %11 = arith.addf %8, %10 : vector<64x128xf32>
    %c0_12 = arith.constant 0 : index
    %c0_13 = arith.constant 0 : index
    %12 = vector.load %arg15[%c0_12, %c0_13] : memref<64x128xf32, #tpu.memory_space<vmem>>, vector<64x128xf32>
    tpu.vector_store %arg15[%c0_12, %c0_13], %11 {strides = array<i32>} : memref<64x128xf32, #tpu.memory_space<vmem>>, vector<64x128xf32>,
    %cst_14 = arith.constant 0.000000e+00 : f32
    %13 = vector.broadcast %cst_14 : f32 to vector<8x32xf32>
    %c0_i32 = arith.constant 0 : i32
    %14 = arith.subi %1, %c0_i32 : i32
    %15 = arith.addi %c0_i32, %14 : i32
    %c1_i32 = arith.constant 1 : i32
    %16:4 = scf.for %arg16 = %c0_i32 to %15 step %c1_i32 iter_args(%arg17 = %13, %arg18 = %13, %arg19 = %13, %arg20 = %13) -> (vector<8x32xf32>, vector<8x32xf32>, vector<8x32xf32>, vector<8x32xf32>)  : i32 {
      %63 = tpu.concatenate %arg17, %arg19 in 1 : vector<8x32xf32>, vector<8x32xf32> -> vector<8x64xf32>
      %64 = arith.truncf %63 : vector<8x64xf32> to vector<8x64xbf16>
      %cst_37 = arith.constant dense<0.000000e+00> : vector<8x256xf32>
      %65 = tpu.matmul %64, %2, %cst_37 {dimension_numbers = #tpu.dot_dimension_numbers<[1], [0], [0], [1], [0, 0, 1, 1], [], []>} : vector<8x64xbf16>, vector<64x256xbf16>, vector<8x256xf32> -> vector<8x256xf32>
      %c8_i32 = arith.constant 8 : i32
      %66 = arith.muli %arg16, %c8_i32 : i32
      %67 = tpu.assume_multiple %66, 8 : i32
      %68 = vector.extract_strided_slice %65 {offsets = [0, 0], sizes = [8, 128], strides = [1, 1]} : vector<8x256xf32> to vector<8x128xf32>
      %69 = arith.index_cast %67 : i32 to index
      %c0_38 = arith.constant 0 : index
      %70 = vector.load %arg15[%69, %c0_38] : memref<64x128xf32, #tpu.memory_space<vmem>>, vector<8x128xf32>
      %71 = arith.addf %68, %70 : vector<8x128xf32>
      %72 = vector.extract_strided_slice %71 {offsets = [0, 0], sizes = [8, 96], strides = [1, 1]} : vector<8x128xf32> to vector<8x96xf32>
      %73 = arith.negf %72 : vector<8x96xf32>
      %74 = math.exp %73 : vector<8x96xf32>
      %cst_39 = arith.constant 1.000000e+00 : f32
      %75 = vector.broadcast %cst_39 : f32 to vector<8x96xf32>
      %76 = arith.addf %75, %74 : vector<8x96xf32>
      %77 = arith.divf %75, %76 : vector<8x96xf32>
      %78 = vector.extract_strided_slice %71 {offsets = [0, 96], sizes = [8, 32], strides = [1, 1]} : vector<8x128xf32> to vector<8x32xf32>
      %79 = math.tanh %78 : vector<8x32xf32>
      %80 = vector.extract_strided_slice %77 {offsets = [0, 0], sizes = [8, 32], strides = [1, 1]} : vector<8x96xf32> to vector<8x32xf32>
      %81 = vector.extract_strided_slice %77 {offsets = [0, 32], sizes = [8, 32], strides = [1, 1]} : vector<8x96xf32> to vector<8x32xf32>
      %82 = vector.extract_strided_slice %77 {offsets = [0, 64], sizes = [8, 32], strides = [1, 1]} : vector<8x96xf32> to vector<8x32xf32>
      %83 = arith.mulf %81, %arg18 : vector<8x32xf32>
      %84 = arith.mulf %80, %79 : vector<8x32xf32>
      %85 = arith.addf %83, %84 : vector<8x32xf32>
      %86 = math.tanh %85 : vector<8x32xf32>
      %87 = arith.mulf %82, %86 : vector<8x32xf32>
      %88 = vector.broadcast %arg16 : i32 to vector<8x1xi32>
      %89 = arith.cmpi slt, %88, %0 : vector<8x1xi32>
      %90 = vector.shape_cast %89 : vector<8x1xi1> to vector<8x1xi1>
      %91 = vector.broadcast %90 : vector<8x1xi1> to vector<8x32xi1>
      %92 = arith.select %91, %87, %arg17 : vector<8x32xi1>, vector<8x32xf32>
      %93 = vector.shape_cast %89 : vector<8x1xi1> to vector<8x1xi1>
      %94 = vector.broadcast %93 : vector<8x1xi1> to vector<8x32xi1>
      %95 = arith.select %94, %85, %arg18 : vector<8x32xi1>, vector<8x32xf32>
      %96 = vector.extract_strided_slice %65 {offsets = [0, 128], sizes = [8, 128], strides = [1, 1]} : vector<8x256xf32> to vector<8x128xf32>
      %97 = arith.addf %96, %5 : vector<8x128xf32>
      %98 = vector.extract_strided_slice %97 {offsets = [0, 0], sizes = [8, 96], strides = [1, 1]} : vector<8x128xf32> to vector<8x96xf32>
      %99 = arith.negf %98 : vector<8x96xf32>
      %100 = math.exp %99 : vector<8x96xf32>
      %cst_40 = arith.constant 1.000000e+00 : f32
      %101 = vector.broadcast %cst_40 : f32 to vector<8x96xf32>
      %102 = arith.addf %101, %100 : vector<8x96xf32>
      %103 = arith.divf %101, %102 : vector<8x96xf32>
      %104 = vector.extract_strided_slice %97 {offsets = [0, 96], sizes = [8, 32], strides = [1, 1]} : vector<8x128xf32> to vector<8x32xf32>
      %105 = math.tanh %104 : vector<8x32xf32>
      %106 = vector.extract_strided_slice %103 {offsets = [0, 0], sizes = [8, 32], strides = [1, 1]} : vector<8x96xf32> to vector<8x32xf32>
      %107 = vector.extract_strided_slice %103 {offsets = [0, 32], sizes = [8, 32], strides = [1, 1]} : vector<8x96xf32> to vector<8x32xf32>
      %108 = vector.extract_strided_slice %103 {offsets = [0, 64], sizes = [8, 32], strides = [1, 1]} : vector<8x96xf32> to vector<8x32xf32>
      %109 = arith.mulf %107, %arg20 : vector<8x32xf32>
      %110 = arith.mulf %106, %105 : vector<8x32xf32>
      %111 = arith.addf %109, %110 : vector<8x32xf32>
      %112 = math.tanh %111 : vector<8x32xf32>
      %113 = arith.mulf %108, %112 : vector<8x32xf32>
      %c1_i32_41 = arith.constant 1 : i32
      %114 = arith.subi %arg16, %c1_i32_41 : i32
      %c0_i32_42 = arith.constant 0 : i32
      %115 = vector.broadcast %c0_i32_42 : i32 to vector<8x1xi32>
      %116 = vector.broadcast %114 : i32 to vector<8x1xi32>
      %117 = arith.cmpi sge, %116, %115 : vector<8x1xi32>
      %118 = vector.broadcast %114 : i32 to vector<8x1xi32>
      %119 = arith.cmpi slt, %118, %0 : vector<8x1xi32>
      %120 = arith.andi %117, %119 : vector<8x1xi1>
      %121 = vector.shape_cast %120 : vector<8x1xi1> to vector<8x1xi1>
      %122 = vector.broadcast %121 : vector<8x1xi1> to vector<8x32xi1>
      %123 = arith.select %122, %113, %arg19 : vector<8x32xi1>, vector<8x32xf32>
      %124 = vector.shape_cast %120 : vector<8x1xi1> to vector<8x1xi1>
      %125 = vector.broadcast %124 : vector<8x1xi1> to vector<8x32xi1>
      %126 = arith.select %125, %111, %arg20 : vector<8x32xi1>, vector<8x32xf32>
      scf.yield %92, %95, %123, %126 : vector<8x32xf32>, vector<8x32xf32>, vector<8x32xf32>, vector<8x32xf32>
    }
    %17 = tpu.concatenate %16#0, %16#2 in 1 : vector<8x32xf32>, vector<8x32xf32> -> vector<8x64xf32>
    %18 = arith.truncf %17 : vector<8x64xf32> to vector<8x64xbf16>
    %19 = vector.extract_strided_slice %2 {offsets = [0, 128], sizes = [64, 128], strides = [1, 1]} : vector<64x256xbf16> to vector<64x128xbf16>
    %cst_15 = arith.constant dense<0.000000e+00> : vector<8x128xf32>
    %20 = tpu.matmul %18, %19, %cst_15 {dimension_numbers = #tpu.dot_dimension_numbers<[1], [0], [0], [1], [0, 0, 1, 1], [], []>} : vector<8x64xbf16>, vector<64x128xbf16>, vector<8x128xf32> -> vector<8x128xf32>
    %21 = arith.addf %20, %5 : vector<8x128xf32>
    %22 = vector.extract_strided_slice %21 {offsets = [0, 0], sizes = [8, 96], strides = [1, 1]} : vector<8x128xf32> to vector<8x96xf32>
    %23 = arith.negf %22 : vector<8x96xf32>
    %24 = math.exp %23 : vector<8x96xf32>
    %cst_16 = arith.constant 1.000000e+00 : f32
    %25 = vector.broadcast %cst_16 : f32 to vector<8x96xf32>
    %26 = arith.addf %25, %24 : vector<8x96xf32>
    %27 = arith.divf %25, %26 : vector<8x96xf32>
    %28 = vector.extract_strided_slice %21 {offsets = [0, 96], sizes = [8, 32], strides = [1, 1]} : vector<8x128xf32> to vector<8x32xf32>
    %29 = math.tanh %28 : vector<8x32xf32>
    %30 = vector.extract_strided_slice %27 {offsets = [0, 0], sizes = [8, 32], strides = [1, 1]} : vector<8x96xf32> to vector<8x32xf32>
    %31 = vector.extract_strided_slice %27 {offsets = [0, 32], sizes = [8, 32], strides = [1, 1]} : vector<8x96xf32> to vector<8x32xf32>
    %32 = vector.extract_strided_slice %27 {offsets = [0, 64], sizes = [8, 32], strides = [1, 1]} : vector<8x96xf32> to vector<8x32xf32>
    %33 = arith.mulf %31, %16#3 : vector<8x32xf32>
    %34 = arith.mulf %30, %29 : vector<8x32xf32>
    %35 = arith.addf %33, %34 : vector<8x32xf32>
    %36 = math.tanh %35 : vector<8x32xf32>
    %37 = arith.mulf %32, %36 : vector<8x32xf32>
    %c1_i32_17 = arith.constant 1 : i32
    %38 = arith.subi %1, %c1_i32_17 : i32
    %39 = vector.broadcast %38 : i32 to vector<8x1xi32>
    %40 = arith.cmpi slt, %39, %0 : vector<8x1xi32>
    %41 = vector.shape_cast %40 : vector<8x1xi1> to vector<8x1xi1>
    %42 = vector.broadcast %41 : vector<8x1xi1> to vector<8x32xi1>
    %43 = arith.select %42, %37, %16#2 : vector<8x32xi1>, vector<8x32xf32>
    %44 = arith.truncf %43 : vector<8x32xf32> to vector<8x32xbf16>
    %c0_18 = arith.constant 0 : index
    %c0_19 = arith.constant 0 : index
    %45 = vector.load %arg8[%c0_18, %c0_19] : memref<32x8xbf16, #tpu.memory_space<vmem>>, vector<32x8xbf16>
    %cst_20 = arith.constant dense<0.000000e+00> : vector<8x8xf32>
    %46 = tpu.matmul %44, %45, %cst_20 {dimension_numbers = #tpu.dot_dimension_numbers<[1], [0], [0], [1], [0, 0, 1, 1], [], []>} : vector<8x32xbf16>, vector<32x8xbf16>, vector<8x8xf32> -> vector<8x8xf32>
    %c0_21 = arith.constant 0 : index
    %c0_22 = arith.constant 0 : index
    %47 = vector.load %arg3[%c0_21, %c0_22] : memref<8x4xf32, #tpu.memory_space<vmem>>, vector<8x4xf32>
    %48 = arith.truncf %47 : vector<8x4xf32> to vector<8x4xbf16>
    %c0_23 = arith.constant 0 : index
    %c0_24 = arith.constant 0 : index
    %49 = vector.load %arg9[%c0_23, %c0_24] : memref<4x8xbf16, #tpu.memory_space<vmem>>, vector<4x8xbf16>
    %cst_25 = arith.constant dense<0.000000e+00> : vector<8x8xf32>
    %50 = tpu.matmul %48, %49, %cst_25 {dimension_numbers = #tpu.dot_dimension_numbers<[1], [0], [0], [1], [0, 0, 1, 1], [], []>} : vector<8x4xbf16>, vector<4x8xbf16>, vector<8x8xf32> -> vector<8x8xf32>
    %51 = arith.addf %46, %50 : vector<8x8xf32>
    %c0_26 = arith.constant 0 : index
    %c0_27 = arith.constant 0 : index
    %52 = vector.load %arg10[%c0_26, %c0_27] : memref<1x8xf32, #tpu.memory_space<vmem>>, vector<1x8xf32>
    %53 = vector.broadcast %52 : vector<1x8xf32> to vector<8x8xf32>
    %54 = arith.addf %51, %53 : vector<8x8xf32>
    %55 = arith.truncf %54 : vector<8x8xf32> to vector<8x8xbf16>
    %c0_28 = arith.constant 0 : index
    %c0_29 = arith.constant 0 : index
    %56 = vector.load %arg11[%c0_28, %c0_29] : memref<8x2xbf16, #tpu.memory_space<vmem>>, vector<8x2xbf16>
    %cst_30 = arith.constant dense<0.000000e+00> : vector<8x2xf32>
    %57 = tpu.matmul %55, %56, %cst_30 {dimension_numbers = #tpu.dot_dimension_numbers<[1], [0], [0], [1], [0, 0, 1, 1], [], []>} : vector<8x8xbf16>, vector<8x2xbf16>, vector<8x2xf32> -> vector<8x2xf32>
    %c0_31 = arith.constant 0 : index
    %c0_32 = arith.constant 0 : index
    %58 = vector.load %arg12[%c0_31, %c0_32] : memref<1x2xf32, #tpu.memory_space<vmem>>, vector<1x2xf32>
    %59 = vector.broadcast %58 : vector<1x2xf32> to vector<8x2xf32>
    %60 = arith.addf %57, %59 : vector<8x2xf32>
    %c0_33 = arith.constant 0 : index
    %c0_34 = arith.constant 0 : index
    %61 = vector.load %arg13[%c0_33, %c0_34] : memref<8x8xf32, #tpu.memory_space<vmem>>, vector<8x8xf32>
    tpu.vector_store %arg13[%c0_33, %c0_34], %54 {strides = array<i32>} : memref<8x8xf32, #tpu.memory_space<vmem>>, vector<8x8xf32>,
    %c0_35 = arith.constant 0 : index
    %c0_36 = arith.constant 0 : index
    %62 = vector.load %arg14[%c0_35, %c0_36] : memref<8x2xf32, #tpu.memory_space<vmem>>, vector<8x2xf32>
    tpu.vector_store %arg14[%c0_35, %c0_36], %60 {strides = array<i32>} : memref<8x2xf32, #tpu.memory_space<vmem>>, vector<8x2xf32>,
    return
  }
}

</mosaic_0001>

<bundles_post_ra>
// kernel: bipartite_u_forward.1
= control target key start
LH: loop header
LB: loop body
LE: loop exit
PB: predicated region body
PF: predicated region fallthrough
CT: control target
= control target key end

     0   :  { %21 = vsyncpa [#allocation5], 0  ;;  %vm103_vm0 = vcmask 130048   ;;  %v1121_v48 = vmov 0.0   ;;  %v1123_v49 = vmov 0.0   ;;  %v1125_v50 = vmov 0.0   ;;  %s1262_s0 = inlined_call_operand.<no memory space> [shape: s32[1], index: 0, kind: input, shape index: {}]   ;;  %s1263_s1 = inlined_call_operand.vmem [shape: bf16[64,16], index: 1, kind: input, shape index: {}]   ;;  %s1264_s2 = inlined_call_operand.vmem [shape: s32[8,1], index: 2, kind: input, shape index: {}]   ;;  %s1265_s3 = inlined_call_operand.vmem [shape: f32[8,4], index: 3, kind: input, shape index: {}]   ;;  %s1266_s4 = inlined_call_operand.vmem [shape: bf16[16,128], index: 4, kind: input, shape index: {}]   ;;  %s1267_s5 = inlined_call_operand.vmem [shape: f32[1,128], index: 5, kind: input, shape index: {}]   ;;  %s1268_s6 = inlined_call_operand.vmem [shape: bf16[64,256], index: 6, kind: input, shape index: {}]   ;;  %s1269_s7 = inlined_call_operand.vmem [shape: f32[1,128], index: 7, kind: input, shape index: {}]   ;;  %s1270_s8 = inlined_call_operand.vmem [shape: bf16[32,8], index: 8, kind: input, shape index: {}]   ;;  %s1271_s9 = inlined_call_operand.vmem [shape: bf16[4,8], index: 9, kind: input, shape index: {}]   ;;  %s1272_s10 = inlined_call_operand.vmem [shape: f32[1,8], index: 10, kind: input, shape index: {}]   ;;  %s1273_s11 = inlined_call_operand.vmem [shape: bf16[8,2], index: 11, kind: input, shape index: {}]   ;;  %s1274_s12 = inlined_call_operand.vmem [shape: f32[1,2], index: 12, kind: input, shape index: {}]   ;;  %s1275_s13 = inlined_call_operand.hbm [shape: f32[8,8], index: 13, kind: output, shape index: {0}]   ;;  %s1276_s14 = inlined_call_operand.vmem [shape: f32[8,2], index: 14, kind: output, shape index: {1}]  }
   0x1   :  { %v973_v0 = vld [vmem:[%s1264_s2] sm:$0xff]  ;;  %v993_v4 = vld [vmem:[%s1268_s6 + $0x8] sm:$0xf0]  ;;  %v1003_v6 = vld [vmem:[%s1268_s6 + $0x4] sm:$0xf0]  ;;  %p600_p0 = scmp.le.s32.totalorder %s1262_s0, 0 }
   0x2   :  { %v978_v1 = vld [vmem:[%s1268_s6 + $0x4] sm:$0xf]  ;;  %v988_v3 = vld [vmem:[%s1268_s6] sm:$0xf]  ;;  %v998_v5 = vld [vmem:[%s1268_s6 + $0x8] sm:$0xf0] }
   0x3   :  { %v983_v2 = vld [vmem:[%s1268_s6 + $0x4] sm:$0xf]  ;;  %v1008_v7 = vld [vmem:[%s1268_s6 + $0x14] sm:$0xf]  ;;  %v1018_v9 = vld [vmem:[%s1268_s6 + $0x10] sm:$0xf] }
   0x4   :  { %v1013_v8 = vld [vmem:[%s1268_s6 + $0x14] sm:$0xf]  ;;  %v1023_v10 = vld [vmem:[%s1268_s6 + $0x18] sm:$0xf0]  ;;  %v1033_v12 = vld [vmem:[%s1268_s6 + $0x14] sm:$0xf0] }
   0x5   :  { %v1028_v11 = vld [vmem:[%s1268_s6 + $0x18] sm:$0xf0]  ;;  %v1038_v13 = vld [vmem:[%s1268_s6 + $0x24] sm:$0xf]  ;;  %v1048_v15 = vld [vmem:[%s1268_s6 + $0x20] sm:$0xf] }
   0x6   :  { %v1043_v14 = vld [vmem:[%s1268_s6 + $0x24] sm:$0xf]  ;;  %v1053_v16 = vld [vmem:[%s1268_s6 + $0x28] sm:$0xf0]  ;;  %v1063_v18 = vld [vmem:[%s1268_s6 + $0x24] sm:$0xf0] }
   0x7   :  { %v1058_v17 = vld [vmem:[%s1268_s6 + $0x28] sm:$0xf0]  ;;  %v1068_v19 = vld [vmem:[%s1268_s6 + $0x34] sm:$0xf]  ;;  %v1078_v21 = vld [vmem:[%s1268_s6 + $0x30] sm:$0xf] }
   0x8   :  { %v1073_v20 = vld [vmem:[%s1268_s6 + $0x34] sm:$0xf]  ;;  %v1083_v22 = vld [vmem:[%s1268_s6 + $0x38] sm:$0xf0]  ;;  %v1093_v24 = vld [vmem:[%s1268_s6 + $0x34] sm:$0xf0] }
   0x9   :  { %v1088_v23 = vld [vmem:[%s1268_s6 + $0x38] sm:$0xf0]  ;;  %v1098_v25 = vld [vmem:[%s1269_s7] ss:$0 sm:$0xff]  ;;  %v682_v28 = vld [vmem:[%s1263_s1 + $0x8] sm:$0xff]  ;;  %s1135_s2 = smov (!%p600_p0), 0  }
   0xa   :  { %v685_v26 = vld [vmem:[%s1266_s4] sm:$0xff]  ;;  %v683_v29 = vld [vmem:[%s1263_s1 + $0x10] sm:$0xff]  ;;  %v684_v30 = vld [vmem:[%s1263_s1 + $0x18] sm:$0xff] }
   0xb   :  { %v681_v27 = vld [vmem:[%s1263_s1] sm:$0xff]  ;;  %123 = vmatpush.bf16.msra.mxu0 %v685_v26  ;;  %688 = vmatpush.bf16.msra.mxu1 %v685_v26 }
   0xc   :  { %689 = vmatpush.bf16.msra.mxu2 %v685_v26  ;;  %690 = vmatpush.bf16.msra.mxu3 %v685_v26  ;;  %v765_v31 = vld [vmem:[%s1267_s5] ss:$0 sm:$0xff] }
   0xe   :  { %596 = vmatmul.msk.bf16.vlgmr.msra.gmra.mxu0 %vm103_vm0, %v681_v27  ;;  %597 = vmatmul.msk.bf16.vlgmr.msra.gmra.mxu1 %vm103_vm0, %v682_v28 }
   0xf   :  { %598 = vmatmul.msk.bf16.vlgmr.msra.gmra.mxu2 %vm103_vm0, %v683_v29  ;;  %599 = vmatmul.msk.bf16.vlgmr.msra.gmra.mxu3 %vm103_vm0, %v684_v30 }
  0x8b   :  { %v125_v32 = vpop.f32.mrf.mxu0  ;;  %v130_v33 = vpop.f32.mrf.mxu1 }
  0x8c   :  { %v126_v34 = vadd.f32 %v765_v31, %v125_v32  ;;  %v131_v35 = vadd.f32 %v765_v31, %v130_v33 }
  0x8e   :  { %145 = vst [vmem:[#allocation2] sm:$0xff] %v126_v34 }
  0x8f   :  { %147 = vst [vmem:[#allocation2 + $0x10] sm:$0xff] %v131_v35 }
  0x92   :  { %v135_v36 = vpop.f32.mrf.mxu2  ;;  %v140_v37 = vpop.f32.mrf.mxu3 }
  0x93   :  { %v136_v38 = vadd.f32 %v765_v31, %v135_v36  ;;  %v141_v39 = vadd.f32 %v765_v31, %v140_v37  ;;  %v127_v40 = vpop.f32.mrf.mxu0  ;;  %v132_v41 = vpop.f32.mrf.mxu1 }
  0x94   :  { %v128_v42 = vadd.f32 %v765_v31, %v127_v40  ;;  %v133_v43 = vadd.f32 %v765_v31, %v132_v41 }
  0x95   :  { %149 = vst [vmem:[#allocation2 + $0x20] sm:$0xff] %v136_v38 }
  0x96   :  { %151 = vst [vmem:[#allocation2 + $0x30] sm:$0xff] %v141_v39 }
  0x97   :  { %146 = vst [vmem:[#allocation2 + $0x8] sm:$0xff] %v128_v42 }
  0x98   :  { %148 = vst [vmem:[#allocation2 + $0x18] sm:$0xff] %v133_v43 }
  0x9a   :  { %v137_v44 = vpop.f32.mrf.mxu2  ;;  %v142_v45 = vpop.f32.mrf.mxu3  ;;  %565 = sbr.rel (%p600_p0) target bundleno = 766 (0x2fe), region = 82 }
  0x9b   :  { %v138_v46 = vadd.f32 %v765_v31, %v137_v44  ;;  %v143_v47 = vadd.f32 %v765_v31, %v142_v45 }
  0x9d   :  { %150 = vst [vmem:[#allocation2 + $0x28] sm:$0xff] %v138_v46 }
  0x9e   :  { %152 = vst [vmem:[#allocation2 + $0x38] sm:$0xff] %v143_v47 }
  0x9f   :  { %v1127_v51 = vmov 0.0   ;;  %v1129_v52 = vmov 0.0   ;;  %v1131_v53 = vmov 0.0   ;;  %v1133_v54 = vmov 0.0  }
  0xa0 LB: > { %v628_v55 = vor.u32 %v1093_v24, %v1078_v21  ;;  %v632_v56 = vor.u32 %v1073_v20, %v1088_v23  ;;  %s886_s23 = smov 64   ;;  %s887_s24 = smov 96   ;;  %v620_v57 = vor.u32 %v1063_v18, %v1048_v15  ;;  %v624_v58 = vor.u32 %v1043_v14, %v1058_v17  ;;  %s872_s2 = sphi %s1135_s2, %s156_s2   ;;  %v868_v54 = vphi %v1133_v54, %v1279_v54   ;;  %v864_v53 = vphi %v1131_v53, %v293_v53   ;;  %v860_v52 = vphi %v1129_v52, %v1278_v52   ;;  %v856_v51 = vphi %v1127_v51, %v1277_v51  }
  0xa1   : > { %164 = vrot.lane.b32.xlu0 %v868_v54, %s886_s23  ;;  %v612_v59 = vor.u32 %v1033_v12, %v1018_v9  ;;  %v616_v60 = vor.u32 %v1013_v8, %v1028_v11  ;;  %v604_v61 = vor.u32 %v1003_v6, %v988_v3  ;;  %v608_v62 = vor.u32 %v983_v2, %v998_v5  ;;  %s635_s25 = sshll.u32 %s872_s2, 3  ;;  %s888_s27 = smov 32  }
  0xa2   : > { %222 = vmatpush.bf16.msra.mxu0 %v628_v55  ;;  %235 = vmatpush.bf16.msra.mxu1 %v632_v56  ;;  %vm171_vm1 = vcmask 261120   ;;  %vm214_vm2 = vcmask 523264   ;;  %s245_s26 = scalar_lea.vmem [#allocation2], %s635_s25  ;;  %v889_v45 = vmov 0   ;;  %s638_s28 = sadd.s32 4294967295, %s872_s2 }
  0xa3   : > { %766 = vset.pattern.permute.xlu2 %v889_v45  ;;  %767 = vset.pattern.permute.xlu0 %v889_v45 }
  0xa5   : > { %v246_v29 = vld [vmem:[%s245_s26] sm:$0xff] }
  0xa6   : > { %223 = vmatpush.bf16.msra.mxu0 %v620_v57  ;;  %236 = vmatpush.bf16.msra.mxu1 %v624_v58 }
  0xa9   : > { %168 = vrot.lane.b32.xlu0 %v860_v52, %s887_s24 }
  0xaa   : > { %224 = vmatpush.bf16.msra.mxu0 %v612_v59  ;;  %237 = vmatpush.bf16.msra.mxu1 %v616_v60 }
  0xae   : > { %225 = vmatpush.bf16.msra.mxu0 %v604_v61  ;;  %238 = vmatpush.bf16.msra.mxu1 %v608_v62 }
 0x113   : > { %v165_v63 = vpop.permute.xlu0 %164 }
 0x11b   : > { %v169_v26 = vpop.permute.xlu0 %168 }
 0x11c   : > { %v172_v27 = vsel %vm171_vm1, %v165_v63, %v169_v26 }
 0x11d   : > { %v173_v28 = vpack.c.bf16 %v172_v27, %v172_v27 }
 0x11f   : > { %633 = vmatmul.msk.bf16.vlgmr.msra.gmra.mxu0 %vm214_vm2, %v173_v28  ;;  %634 = vmatmul.msk.bf16.vlgmr.msra.gmra.mxu1 %vm214_vm2, %v173_v28 }
 0x19c   : > { %v227_v30 = vpop.f32.mrf.mxu0  ;;  %v240_v31 = vpop.f32.mrf.mxu1 }
 0x19d   : > { %v247_v32 = vadd.f32 %v246_v29, %v227_v30  ;;  %v294_v33 = vadd.f32 %v1098_v25, %v240_v31 }
 0x19f   : > { %768 = vtanh.f32 %v247_v32  ;;  %v636_v38 = vmul.f32 -1.442695, %v247_v32  ;;  %v637_v39 = vmul.f32 -1.442695, %v294_v33 }
 0x1a0   : > { %770 = vtanh.f32 %v294_v33 }
 0x1a1   : > { %772 = vpow2.f32 %v636_v38 }
 0x1a2   : > { %774 = vpow2.f32 %v637_v39 }
 0x1a4   : > { %v229_v34 = vpop.f32.mrf.mxu0  ;;  %v242_v35 = vpop.f32.mrf.mxu1 }
 0x1a5   : > { %v769_v36 = vpop.eup %768  ;;  %v285_v35 = vstv %s872_s2  ;;  %s156_s2 = sadd.s32 1, %s872_s2  }
 0x1a6   : > { %270 = vrot.lane.b32.xlu1 %v769_v36, %s888_s27  ;;  %v771_v37 = vpop.eup %770  ;;  %vm286_vm11 = vcmp.lt.s32.totalorder %v285_v35, %v973_v0  ;;  %p155_p1 = scmp.ge.s32.totalorder %s156_s2, %s1262_s0 }
 0x1a7   : > { %v773_v40 = vpop.eup %772  ;;  %v287_v36 = vsel %vm286_vm11, 1, %v889_v45 }
 0x1a8   : > { %v251_v41 = vadd.f32 1.0, %v773_v40  ;;  %v775_v42 = vpop.eup %774  ;;  %v333_v40 = vstv %s638_s28 }
 0x1a9   : > { %v298_v43 = vadd.f32 1.0, %v775_v42  ;;  %vm334_vm12 = vcmp.ge.s32.totalorder %v333_v40, 0  ;;  %vm335_vm13 = vcmp.lt.s32.totalorder %v333_v40, %v973_v0 }
 0x1aa   : > { %776 = vrcp.f32 %v251_v41  ;;  %v263_v57 = vand.u32 2147483648, %v251_v41  ;;  %vm257_vm4 = vweird.f32 %v251_v41  ;;  %v261_v58 = vand.u32 2147483647, %v251_v41  ;;  %vm336_vm14 = vmand %vm334_vm12, %vm335_vm13 }
 0x1ab   : > { %778 = vrcp.f32 %v298_v43  ;;  %v310_v28 = vand.u32 2147483648, %v298_v43  ;;  %vm304_vm8 = vweird.f32 %v298_v43  ;;  %v308_v29 = vand.u32 2147483647, %v298_v43 }
 0x1ac   : > { %v264_v61 = vor.u32 1.1754944e-38, %v263_v57  ;;  %vm262_vm6 = vcmp.eq.f32.partialorder %v261_v58, 8.507059e+37 }
 0x1ad   : > { %v311_v31 = vor.u32 1.1754944e-38, %v310_v28  ;;  %vm309_vm10 = vcmp.eq.f32.partialorder %v308_v29, 8.507059e+37 }
 0x1ae   : > { %317 = vrot.lane.b32.xlu1 %v771_v37, %s888_s27 }
 0x1b0   : > { %v777_v44 = vpop.eup %776 }
 0x1b1   : > { %v253_v46 = vmul.f32 %v777_v44, %v251_v41  ;;  %v779_v48 = vpop.eup %778  ;;  %vm258_vm3 = vweird.f32 %v777_v44 }
 0x1b2   : > { %v300_v50 = vmul.f32 %v779_v48, %v298_v43  ;;  %vm259_vm5 = vmor %vm257_vm4, %vm258_vm3  ;;  %vm305_vm7 = vweird.f32 %v779_v48 }
 0x1b3   : > { %v254_v47 = vsub.f32 1.0, %v253_v46  ;;  %vm306_vm9 = vmor %vm304_vm8, %vm305_vm7  ;;  %v337_v46 = vsel %vm336_vm14, 1, %v889_v45 }
 0x1b4   : > { %v301_v56 = vsub.f32 1.0, %v300_v50 }
 0x1b5   : > { %v255_v49 = vmul.f32 %v777_v44, %v254_v47 }
 0x1b6   : > { %v302_v60 = vmul.f32 %v779_v48, %v301_v56 }
 0x1b7   : > { %v256_v55 = vadd.f32 %v777_v44, %v255_v49 }
 0x1b8   : > { %v303_v27 = vadd.f32 %v779_v48, %v302_v60 }
 0x1b9   : > { %v260_v59 = vsel %vm259_vm5, %v777_v44, %v256_v55 }
 0x1ba   : > { %v265_v63 = vsel %vm262_vm6, %v264_v61, %v260_v59  ;;  %v307_v30 = vsel %vm306_vm9, %v779_v48, %v303_v27 }
 0x1bb   : > { %v312_v32 = vsel %vm309_vm10, %v311_v31, %v307_v30  ;;  %v268_v37 = vmul.f32 %v864_v53, %v265_v63 }
 0x1bc   : > { %v315_v41 = vmul.f32 %v856_v51, %v312_v32 }
 0x218   : > { %v271_v62 = vpop.permute.xlu1 %270 }
 0x219   : > { %v273_v26 = vmul.f32 %v271_v62, %v265_v63 }
 0x21b   : > { %275 = vrot.lane.b32.xlu2 %v273_v26, %s888_s27 }
 0x220   : > { %v318_v33 = vpop.permute.xlu1 %317 }
 0x221   : > { %v320_v34 = vmul.f32 %v318_v33, %v312_v32 }
 0x223   : > { %322 = vrot.lane.b32.xlu2 %v320_v34, %s888_s27 }
 0x22b   : > { %289 = vperm.xlu2 %766, %v287_v36  }
 0x275   : > { %v276_v38 = vpop.permute.xlu2 %275 }
 0x276   : > { %v278_v39 = vadd.f32 %v276_v38, %v268_v37 }
 0x278   : > { %780 = vtanh.f32 %v278_v39 }
 0x27d   : > { %v323_v42 = vpop.permute.xlu2 %322 }
 0x27e   : > { %v781_v43 = vpop.eup %780  ;;  %v325_v44 = vadd.f32 %v323_v42, %v315_v41 }
 0x27f   : > { %281 = vrot.lane.b32.xlu0 %v781_v43, %s888_s27 }
 0x280   : > { %782 = vtanh.f32 %v325_v44 }
 0x285   : > { %v290_v47 = vpop.permute.xlu2 %289 }
 0x286   : > { %v783_v48 = vpop.eup %782  ;;  %vm291_vm15 = vcmp.eq.s32.totalorder %v290_v47, 1 }
 0x287   : > { %v293_v53 = vsel %vm291_vm15, %v278_v39, %v864_v53   ;;  %339 = vperm.xlu0 %767, %v337_v46   ;;  %328 = vrot.lane.b32.xlu1 %v783_v48, %s888_s27 }
 0x2f1   : > { %v282_v49 = vpop.permute.xlu0 %281 }
 0x2f2   : > { %v284_v50 = vmul.f32 %v282_v49, %v265_v63 }
 0x2f4   : > { %v292_v55 = vsel %vm291_vm15, %v284_v50, %v868_v54  }
 0x2f5   : > { %v1279_v54 = vmov %v292_v55  ;;  %v1282_v50 = vmov (%p155_p1), %v292_v55 }
 0x2f9   : > { %v340_v56 = vpop.permute.xlu0 %339  ;;  %v329_v57 = vpop.permute.xlu1 %328  ;;  %158 = sbr.rel (!%p155_p1) target bundleno = 160 (0xa0), region = 88 }
 0x2fa   : > { %vm341_vm0 = vcmp.eq.s32.totalorder %v340_v56, 1  ;;  %v331_v58 = vmul.f32 %v329_v57, %v312_v32 }
 0x2fb   : > { %v343_v59 = vsel %vm341_vm0, %v325_v44, %v856_v51  }
 0x2fc   : > { %v342_v45 = vsel %vm341_vm0, %v331_v58, %v860_v52   ;;  %v1277_v51 = vmov %v343_v59  ;;  %v1280_v48 = vmov (%p155_p1), %v343_v59 }
 0x2fd   : > { %v1278_v52 = vmov %v342_v45  ;;  %v1281_v49 = vmov (%p155_p1), %v342_v45 }
 0x2fe PF:  { %v654_v54 = vor.u32 %v1068_v19, %v1083_v22  ;;  %s890_s15 = smov 64   ;;  %s891_s16 = smov 96   ;;  %v650_v2 = vor.u32 %v1038_v13, %v1053_v16  ;;  %v646_v3 = vor.u32 %v1008_v7, %v1023_v10  ;;  %v642_v5 = vor.u32 %v978_v1, %v993_v4  ;;  %v687_v27 = vld [vmem:[%s1270_s8 + $0x8] sm:$0xff]  ;;  %v449_v28 = vld [vmem:[%s1271_s9] sm:$0x3]  ;;  %v884_v50 = vphi %v1125_v50, %v1282_v50   ;;  %v880_v49 = vphi %v1123_v49, %v1281_v49   ;;  %v876_v48 = vphi %v1121_v48, %v1280_v48  }
 0x2ff   :  { %345 = vrot.lane.b32.xlu0 %v884_v50, %s890_s15  ;;  %vm352_vm1 = vcmask 261120   ;;  %vm379_vm2 = vcmask 523264   ;;  %s892_s17 = smov 32   ;;  %v893_v52 = vmov 0   ;;  %s657_s6 = sadd.s32 4294967295, %s1262_s0  ;;  %vm454_vm8 = vcmask 1041408   ;;  %495 = vmatpush.bf16.msra.mxu2 %v687_v27 }
 0x300   :  { %387 = vmatpush.bf16.msra.mxu0 %v654_v54  ;;  %784 = vset.pattern.permute.xlu2 %v893_v52  ;;  %v434_v63 = vstv %s657_s6  ;;  %v456_v29 = vsel %vm454_vm8, %v449_v28, 0  ;;  %v447_v30 = vld [vmem:[%s1265_s3] sm:$0xff]  ;;  %vm450_vm9 = vcmask 31744   ;;  %vm517_vm11 = vcmask 1043456   ;;  %s894_s23 = smov [#allocation4]  }
 0x301   :  { %785 = vset.pattern.permute.xlu0 %v893_v52  ;;  %vm435_vm7 = vcmp.lt.s32.totalorder %v434_v63, %v973_v0  ;;  %465 = vmatpush.bf16.msra.mxu1 %v456_v29  ;;  %v686_v0 = vld [vmem:[%s1270_s8] sm:$0xff]  ;;  %v448_v31 = vpack.c.bf16 %v447_v30, %v447_v30  ;;  %vm513_vm12 = vcmask 64512   ;;  %s542_s24 = sshll.u32 %s894_s23, 4  ;;  %vm535_vm13 = vcmask 15360   ;;  %s543_s24 = int_to_ptr.vmem [resolvable:$true] %s542_s24 }
 0x302   :  { %v436_v26 = vsel %vm435_vm7, 1, %v893_v52  ;;  %v508_v40 = vld [vmem:[%s1273_s11] sm:$0xf]  ;;  %s544_s11 = sshll.u32 %s1275_s13, 4  ;;  %s545_s11 = int_to_ptr.hbm [resolvable:$true] %s544_s11 }
 0x303   :  { %496 = vmatpush.bf16.msra.mxu2 %v686_v0  ;;  %v519_v41 = vsel %vm517_vm11, %v508_v40, 0  ;;  %v786_v42 = vld [vmem:[%s1272_s10] ss:$0 sm:$0xff] }
 0x304   :  { %388 = vmatpush.bf16.msra.mxu0 %v650_v2  ;;  %658 = vmatmul.msk.bf16.vlgmr.msra.gmra.mxu1 %vm450_vm9, %v448_v31 }
 0x305   :  { %528 = vmatpush.bf16.msra.mxu3 %v519_v41 }
 0x307   :  { %349 = vrot.lane.b32.xlu0 %v880_v49, %s891_s16 }
 0x308   :  { %389 = vmatpush.bf16.msra.mxu0 %v646_v3 }
 0x30c   :  { %390 = vmatpush.bf16.msra.mxu0 %v642_v5 }
 0x371   :  { %v346_v6 = vpop.permute.xlu0 %345 }
 0x379   :  { %v350_v8 = vpop.permute.xlu0 %349 }
 0x37a   :  { %v353_v9 = vsel %vm352_vm1, %v346_v6, %v350_v8 }
 0x37b   :  { %v354_v11 = vpack.c.bf16 %v353_v9, %v353_v9 }
 0x37d   :  { %655 = vmatmul.msk.bf16.vlgmr.msra.gmra.mxu0 %vm379_vm2, %v354_v11 }
 0x381   :  { %v467_v37 = vpop.f32.mrf.mxu1 }
 0x389   :  { %v469_v38 = vpop.f32.mrf.mxu1 }
 0x3fa   :  { %v392_v12 = vpop.f32.mrf.mxu0 }
 0x3fb   :  { %v393_v13 = vadd.f32 %v1098_v25, %v392_v12 }
 0x3fd   :  { %788 = vtanh.f32 %v393_v13  ;;  %v656_v7 = vmul.f32 -1.442695, %v393_v13 }
 0x3ff   :  { %790 = vpow2.f32 %v656_v7 }
 0x402   :  { %v394_v14 = vpop.f32.mrf.mxu0 }
 0x403   :  { %v789_v15 = vpop.eup %788 }
 0x404   :  { %418 = vrot.lane.b32.xlu1 %v789_v15, %s892_s17 }
 0x405   :  { %v791_v1 = vpop.eup %790 }
 0x406   :  { %v399_v4 = vadd.f32 1.0, %v791_v1 }
 0x408   :  { %792 = vrcp.f32 %v399_v4  ;;  %v411_v20 = vand.u32 2147483648, %v399_v4  ;;  %vm405_vm4 = vweird.f32 %v399_v4  ;;  %v409_v21 = vand.u32 2147483647, %v399_v4 }
 0x40a   :  { %v412_v23 = vor.u32 1.1754944e-38, %v411_v20  ;;  %vm410_vm6 = vcmp.eq.f32.partialorder %v409_v21, 8.507059e+37 }
 0x40e   :  { %v793_v10 = vpop.eup %792 }
 0x40f   :  { %v401_v16 = vmul.f32 %v793_v10, %v399_v4  ;;  %vm406_vm3 = vweird.f32 %v793_v10 }
 0x410   :  { %vm407_vm5 = vmor %vm405_vm4, %vm406_vm3 }
 0x411   :  { %v402_v17 = vsub.f32 1.0, %v401_v16 }
 0x413   :  { %v403_v18 = vmul.f32 %v793_v10, %v402_v17 }
 0x415   :  { %v404_v19 = vadd.f32 %v793_v10, %v403_v18 }
 0x417   :  { %v408_v22 = vsel %vm407_vm5, %v793_v10, %v404_v19 }
 0x418   :  { %v413_v25 = vsel %vm410_vm6, %v412_v23, %v408_v22 }
 0x419   :  { %v416_v53 = vmul.f32 %v876_v48, %v413_v25 }
 0x476   :  { %v419_v24 = vpop.permute.xlu1 %418 }
 0x477   :  { %v421_v51 = vmul.f32 %v419_v24, %v413_v25 }
 0x479   :  { %423 = vrot.lane.b32.xlu1 %v421_v51, %s892_s17 }
 0x4eb   :  { %v424_v60 = vpop.permute.xlu1 %423 }
 0x4ec   :  { %v426_v61 = vadd.f32 %v424_v60, %v416_v53 }
 0x4ee   :  { %794 = vtanh.f32 %v426_v61 }
 0x4f4   :  { %v795_v62 = vpop.eup %794 }
 0x4f5   :  { %429 = vrot.lane.b32.xlu2 %v795_v62, %s892_s17 }
 0x4fd   :  { %438 = vperm.xlu2 %784, %v436_v26  }
 0x54f   :  { %v430_v32 = vpop.permute.xlu2 %429 }
 0x550   :  { %v432_v33 = vmul.f32 %v430_v32, %v413_v25 }
 0x557   :  { %v439_v34 = vpop.permute.xlu2 %438 }
 0x558   :  { %vm440_vm10 = vcmp.eq.s32.totalorder %v439_v34, 1 }
 0x559   :  { %v441_v35 = vsel %vm440_vm10, %v432_v33, %v880_v49  ;;  %v787_v49 = vld [vmem:[%s1274_s12] ss:$0 sm:$0xff] }
 0x55a   :  { %v442_v36 = vpack.c.bf16 %v441_v35, %v441_v35 }
 0x55c   :  { %472 = vrot.lane.b32.xlu0 %v442_v36, %s890_s15 }
 0x5ce   :  { %v473_v39 = vpop.permute.xlu0 %472 }
 0x5cf   :  { %667 = vmatmul.msk.bf16.vlgmr.msra.gmra.mxu2 %vm352_vm1, %v473_v39 }
 0x652   :  { %v498_v43 = vpop.f32.mrf.mxu2 }
 0x653   :  { %v499_v44 = vadd.f32 %v498_v43, %v467_v37 }
 0x655   :  { %v506_v46 = vadd.f32 %v786_v42, %v499_v44 }
 0x657   :  { %v507_v47 = vpack.c.bf16 %v506_v46, %v506_v46  ;;  %534 = vst.msk [vmem:[#allocation4] sm:$0xff] %vm513_vm12, %v506_v46 }
 0x658   :  { %547 = dma.vmem_to_hbm [thread:$0]  %s543_s24, 128, %s545_s11, [#allocation5]  }
 0x659   :  { %668 = vmatmul.msk.bf16.vlgmr.msra.gmra.mxu3 %vm513_vm12, %v507_v47 }
 0x65a   :  { %v500_v48 = vpop.f32.mrf.mxu2 }
 0x6dc   :  { %v530_v50 = vpop.f32.mrf.mxu3 }
 0x6dd   :  { %v531_v55 = vadd.f32 %v787_v49, %v530_v50 }
 0x6df   :  { %536 = vst.msk [vmem:[%s1276_s14] sm:$0xff] %vm535_vm13, %v531_v55 }
 0x6e4   :  { %v532_v56 = vpop.f32.mrf.mxu3 }
 0x6e5   :  { %852 = dma.done.wait [#allocation5], 128  }
 0x6e6   :  { %853 = vsyncadd [#allocation5], 4294967168 }
 0x6e7   :  { %556 = vsyncpa [#allocation5], 1 }

</bundles_post_ra>
